<compile_context>
chip_gen: v7x
topology: tpu7x:2x2x1
jax: 0.10.0
libtpu: 0.0.40
codegen_flags: <defaults>
</compile_context>

<pallas_src>
import functools

import jax
import jax.numpy as jnp
from jax import lax
from jax.experimental import pallas as pl
from jax.experimental.pallas import tpu as pltpu


_MIB = 1024 * 1024


def _vmem_limit_bytes():
    """Scoped-VMEM limit: 64 MiB on 128 MiB parts (v5e/v6e), 44 MiB on 64 MiB parts."""
    try:
        phys = int(pltpu.get_tpu_info().vmem_capacity_bytes)
    except Exception:
        phys = 64 * _MIB  # conservative (v7x-sized) fallback
    if phys >= 128 * _MIB:
        return 64 * _MIB
    return 44 * _MIB


def _pick_tiles(n, c, itemsize, budget):
    """Row/class tile sizes that fit the VMEM budget on every generation."""
    # Class tile: whole C if small, else 2048 lanes (multiple of 128; the
    # ragged last class block is masked in-kernel).  Bounds VMEM for any C.
    tc = c if c <= 2048 else 2048
    tc_pad = -(-tc // 128) * 128
    # Per pipeline step, per logits row: 2 double-buffered input copies (input
    # dtype) + ~20 B live f32 temporaries (z, masked z / exp, iota, select).
    per_row_bytes = tc_pad * (2 * itemsize + 20) + 64
    tm = int(budget // per_row_bytes)
    tm = (tm // 8) * 8
    tm = max(8, min(tm, 512))          # 512-row cap: already at HBM roofline
    if n < 8:
        return n, tc                   # block dim == full array dim (legal)
    return min(tm, (n // 8) * 8), tc


def _ce_kernel(logits_ref, labels_ref, out_ref,
               m_acc, se_acc, zlab_acc, sz_acc, loss_acc, *,
               inv_temp, smoothing, n_rows, n_cols, tm, tc):
    i = pl.program_id(0)               # row-block index     (outer)
    j = pl.program_id(1)               # class-block index   (inner, online LSE)
    ni = pl.num_programs(0)
    nj = pl.num_programs(1)

    @pl.when(jnp.logical_and(i == 0, j == 0))
    def _():
        loss_acc[...] = jnp.zeros_like(loss_acc)

    @pl.when(j == 0)
    def _():
        m_acc[...] = jnp.full_like(m_acc, -jnp.inf)
        se_acc[...] = jnp.zeros_like(se_acc)
        zlab_acc[...] = jnp.zeros_like(zlab_acc)
        if smoothing > 0.0:
            sz_acc[...] = jnp.zeros_like(sz_acc)

    # (tm, tc) block of logits, scaled by 1/temp, upcast to f32 in-kernel.
    z = logits_ref[...].astype(jnp.float32) * inv_temp

    # Class-column validity mask (ragged last class block).
    col = lax.broadcasted_iota(jnp.int32, z.shape, 1) + j * tc
    col_ok = col < n_cols
    z_m = jnp.where(col_ok, z, -jnp.inf)

    # Online logsumexp update along the lane (class) axis.
    m_old = m_acc[...]
    m_new = jnp.maximum(m_old, jnp.max(z_m, axis=-1, keepdims=True))
    p = jnp.exp(z_m - m_new)                       # invalid cols -> exp(-inf)=0
    se_acc[...] = se_acc[...] * jnp.exp(m_old - m_new) + jnp.sum(
        p, axis=-1, keepdims=True)
    m_acc[...] = m_new

    # z[label]: select against the class iota; no log-softmax materialization.
    lbl = labels_ref[...]                          # (tm, 1) int32
    zlab_acc[...] += jnp.sum(jnp.where(col == lbl, z, 0.0),
                             axis=-1, keepdims=True)

    if smoothing > 0.0:
        sz_acc[...] += jnp.sum(jnp.where(col_ok, z, 0.0),
                               axis=-1, keepdims=True)

    @pl.when(j == nj - 1)
    def _():
        lse = m_acc[...] + jnp.log(se_acc[...])                    # (tm, 1)
        nll = lse - zlab_acc[...]
        if smoothing > 0.0:
            smooth = lse - sz_acc[...] * (1.0 / n_cols)
            per_row = (1.0 - smoothing) * nll + smoothing * smooth
        else:
            per_row = nll
        # Mask rows past the end of the batch (ragged last row block).
        row = lax.broadcasted_iota(jnp.int32, (tm, 1), 0) + i * tm
        per_row = jnp.where(row < n_rows, per_row, 0.0)
        loss_acc[...] += per_row                                   # VPU add

    @pl.when(jnp.logical_and(i == ni - 1, j == nj - 1))
    def _():
        # Single cross-lane/sublane reduction at the very end; lane-dense tile.
        out_ref[...] = jnp.zeros_like(out_ref) + jnp.sum(loss_acc[...])


def _cross_entropy_pallas(logits, labels, *, temp, smoothing):
    n, c = logits.shape
    itemsize = jnp.dtype(logits.dtype).itemsize

    vmem_limit = _vmem_limit_bytes()
    budget = (vmem_limit * 3) // 4
    tm, tc = _pick_tiles(n, c, itemsize, budget)

    ni = pl.cdiv(n, tm)
    nj = pl.cdiv(c, tc)

    labels2d = labels.astype(jnp.int32).reshape(n, 1)

    kernel = functools.partial(
        _ce_kernel,
        inv_temp=float(1.0 / temp),
        smoothing=float(smoothing),
        n_rows=n,
        n_cols=c,
        tm=tm,
        tc=tc,
    )

    partial = pl.pallas_call(
        kernel,
        # One (8, 128) f32 slot; element [0, 0] holds the summed loss.
        out_shape=jax.ShapeDtypeStruct((8, 128), jnp.float32),
        grid_spec=pltpu.PrefetchScalarGridSpec(
            num_scalar_prefetch=0,
            grid=(ni, nj),
            in_specs=[
                pl.BlockSpec((tm, tc), lambda i, j: (i, j)),
                pl.BlockSpec((tm, 1), lambda i, j: (i, 0)),
            ],
            out_specs=pl.BlockSpec((8, 128), lambda i, j: (0, 0)),
            scratch_shapes=[
                pltpu.VMEM((tm, 1), jnp.float32),   # running max
                pltpu.VMEM((tm, 1), jnp.float32),   # running sum(exp)
                pltpu.VMEM((tm, 1), jnp.float32),   # z[label]
                pltpu.VMEM((tm, 1), jnp.float32),   # sum(z) (smoothing)
                pltpu.VMEM((tm, 1), jnp.float32),   # per-row loss accumulator
            ],
        ),
        compiler_params=pltpu.CompilerParams(
            dimension_semantics=("arbitrary", "arbitrary"),
            vmem_limit_bytes=int(vmem_limit)),
    )(logits, labels2d)

    return partial[0, 0] / jnp.float32(n)


class Softmax:
    """JAX/Pallas port of the PyTorch Softmax loss module (forward pass)."""

    def __init__(self, **options):
        self.temp = options["temp"]
        self.label_smoothing = options["label_smoothing"]

    def forward(self, x, y, labels=None):
        logits = y
        if labels is None:
            return (logits, 0)
        loss = _cross_entropy_pallas(
            logits, labels,
            temp=self.temp,
            smoothing=self.label_smoothing if self.label_smoothing else 0.0,
        )
        return (logits, loss)

    __call__ = forward


def _reference_loss(logits, labels, temp, smoothing):
    """Pure-JAX reference mirroring F.cross_entropy / smooth_cross_entropy_loss."""
    z = logits.astype(jnp.float32) / temp
    logp = jax.nn.log_softmax(z, axis=-1)
    nll = -jnp.take_along_axis(logp, labels[:, None].astype(jnp.int32), axis=-1)[:, 0]
    if smoothing:
        smooth = -jnp.mean(logp, axis=-1)
        per_row = (1.0 - smoothing) * nll + smoothing * smooth
    else:
        per_row = nll
    return jnp.mean(per_row)


if __name__ == "__main__":
    key = jax.random.PRNGKey(0)
    k_emb, k_logits, k_labels, k_l2, k_lab2, k_l3, k_lab3 = jax.random.split(key, 7)

    N, E, C = 8, 16, 32                      # batch, embedding dim, num classes
    x = jax.random.normal(k_emb, (N, E), dtype=jnp.float32)       # embeddings (unused)
    y = jax.random.normal(k_logits, (N, C), dtype=jnp.float32)    # logits [N, C]
    labels = jax.random.randint(k_labels, (N,), 0, C, dtype=jnp.int32)

    # Case 1: plain cross entropy with temperature (label_smoothing falsy).
    mod_plain = Softmax(temp=0.1, label_smoothing=0.0)
    logits_out, loss_plain = mod_plain(x, y, labels)
    loss_plain = jax.block_until_ready(loss_plain)
    ref_plain = _reference_loss(y, labels, 0.1, 0.0)
    assert jnp.allclose(loss_plain, ref_plain, rtol=1e-5, atol=1e-5), (
        loss_plain, ref_plain)
    assert logits_out.shape == y.shape

    # Case 2: label-smoothed cross entropy.
    mod_smooth = Softmax(temp=0.1, label_smoothing=0.1)
    _, loss_smooth = mod_smooth(x, y, labels)
    loss_smooth = jax.block_until_ready(loss_smooth)
    ref_smooth = _reference_loss(y, labels, 0.1, 0.1)
    assert jnp.allclose(loss_smooth, ref_smooth, rtol=1e-5, atol=1e-5), (
        loss_smooth, ref_smooth)

    # Case 3: labels is None -> passthrough.
    out_logits, zero = mod_plain(x, y, None)
    assert zero == 0 and out_logits is y

    # Case 4: ragged batch (N not a multiple of 8) and C not a multiple of 128
    # (single full-extent class block) exercises the row-validity mask.
    N2, C2 = 13, 160
    y2 = jax.random.normal(k_l2, (N2, C2), dtype=jnp.float32)
    labels2 = jax.random.randint(k_lab2, (N2,), 0, C2, dtype=jnp.int32)
    mod_ragged = Softmax(temp=2.0, label_smoothing=0.1)
    _, loss_ragged = mod_ragged(None, y2, labels2)
    loss_ragged = jax.block_until_ready(loss_ragged)
    ref_ragged = _reference_loss(y2, labels2, 2.0, 0.1)
    assert jnp.allclose(loss_ragged, ref_ragged, rtol=1e-5, atol=1e-5), (
        loss_ragged, ref_ragged)

    # Case 5: C > 2048 exercises class-axis tiling + online logsumexp, with a
    # ragged last class block (2100 % 128 != 0) and a ragged last row block.
    N3, C3 = 10, 2100
    y3 = jax.random.normal(k_l3, (N3, C3), dtype=jnp.float32)
    labels3 = jax.random.randint(k_lab3, (N3,), 0, C3, dtype=jnp.int32)
    mod_tiled = Softmax(temp=1.0, label_smoothing=0.1)
    _, loss_tiled = mod_tiled(None, y3, labels3)
    loss_tiled = jax.block_until_ready(loss_tiled)
    ref_tiled = _reference_loss(y3, labels3, 1.0, 0.1)
    assert jnp.allclose(loss_tiled, ref_tiled, rtol=1e-4, atol=1e-5), (
        loss_tiled, ref_tiled)

    # Case 6: bf16 logits stay bf16 in HBM; upcast happens inside the kernel.
    y_bf16 = y.astype(jnp.bfloat16)
    _, loss_bf16 = mod_smooth(x, y_bf16, labels)
    loss_bf16 = jax.block_until_ready(loss_bf16)
    ref_bf16 = _reference_loss(y_bf16, labels, 0.1, 0.1)
    assert jnp.allclose(loss_bf16, ref_bf16, rtol=1e-5, atol=1e-5), (
        loss_bf16, ref_bf16)

    print("KERNEL_OK")
</pallas_src>

<mosaic_0001>
module attributes {stable_mosaic.version = 11 : i64} {
  func.func @_ce_kernel(%arg0: i32, %arg1: i32, %arg2: memref<8x32xf32, #tpu.memory_space<vmem>>, %arg3: memref<8x1xi32, #tpu.memory_space<vmem>>, %arg4: memref<8x128xf32, #tpu.memory_space<vmem>>, %arg5: memref<8x1xf32, #tpu.memory_space<vmem>>, %arg6: memref<8x1xf32, #tpu.memory_space<vmem>>, %arg7: memref<8x1xf32, #tpu.memory_space<vmem>>, %arg8: memref<8x1xf32, #tpu.memory_space<vmem>>, %arg9: memref<8x1xf32, #tpu.memory_space<vmem>>) attributes {dimension_semantics = [#tpu.dimension_semantics<arbitrary>, #tpu.dimension_semantics<arbitrary>], iteration_bounds = array<i64: 1, 1>, scalar_prefetch = 0 : i64, scratch_operands = 5 : i64, tpu.core_type = #tpu.core_type<tc>, window_params = [{transform_indices = @transform_0, window_bounds = array<i64: 8, 32>}, {transform_indices = @transform_1, window_bounds = array<i64: 8, 1>}, {pipeline_mode = #tpu.pipeline_mode<synchronous>, transform_indices = @transform_2, window_bounds = array<i64: 8, 128>}]} {
    %c0_i32 = arith.constant 0 : i32
    %0 = arith.cmpi eq, %arg0, %c0_i32 : i32
    %c0_i32_0 = arith.constant 0 : i32
    %1 = arith.cmpi eq, %arg1, %c0_i32_0 : i32
    %2 = arith.andi %0, %1 : i1
    %3 = arith.extui %2 : i1 to i32
    %c0_i32_1 = arith.constant 0 : i32
    %4 = arith.cmpi ne, %3, %c0_i32_1 : i32
    scf.if %4 {
      %cst_30 = arith.constant 0.000000e+00 : f32
      %53 = vector.broadcast %cst_30 : f32 to vector<8x1xf32>
      %c0_31 = arith.constant 0 : index
      %c0_32 = arith.constant 0 : index
      %54 = vector.load %arg9[%c0_31, %c0_32] : memref<8x1xf32, #tpu.memory_space<vmem>>, vector<8x1xf32>
      tpu.vector_store %arg9[%c0_31, %c0_32], %53 {strides = array<i32>} : memref<8x1xf32, #tpu.memory_space<vmem>>, vector<8x1xf32>,
    } else {
    }
    %c0_i32_2 = arith.constant 0 : i32
    %5 = arith.cmpi eq, %arg1, %c0_i32_2 : i32
    %6 = arith.extui %5 : i1 to i32
    %c0_i32_3 = arith.constant 0 : i32
    %7 = arith.cmpi ne, %6, %c0_i32_3 : i32
    scf.if %7 {
      %cst_30 = arith.constant 0xFF800000 : f32
      %53 = vector.broadcast %cst_30 : f32 to vector<8x1xf32>
      %c0_31 = arith.constant 0 : index
      %c0_32 = arith.constant 0 : index
      %54 = vector.load %arg5[%c0_31, %c0_32] : memref<8x1xf32, #tpu.memory_space<vmem>>, vector<8x1xf32>
      tpu.vector_store %arg5[%c0_31, %c0_32], %53 {strides = array<i32>} : memref<8x1xf32, #tpu.memory_space<vmem>>, vector<8x1xf32>,
      %cst_33 = arith.constant 0.000000e+00 : f32
      %55 = vector.broadcast %cst_33 : f32 to vector<8x1xf32>
      %c0_34 = arith.constant 0 : index
      %c0_35 = arith.constant 0 : index
      %56 = vector.load %arg6[%c0_34, %c0_35] : memref<8x1xf32, #tpu.memory_space<vmem>>, vector<8x1xf32>
      tpu.vector_store %arg6[%c0_34, %c0_35], %55 {strides = array<i32>} : memref<8x1xf32, #tpu.memory_space<vmem>>, vector<8x1xf32>,
      %cst_36 = arith.constant 0.000000e+00 : f32
      %57 = vector.broadcast %cst_36 : f32 to vector<8x1xf32>
      %c0_37 = arith.constant 0 : index
      %c0_38 = arith.constant 0 : index
      %58 = vector.load %arg7[%c0_37, %c0_38] : memref<8x1xf32, #tpu.memory_space<vmem>>, vector<8x1xf32>
      tpu.vector_store %arg7[%c0_37, %c0_38], %57 {strides = array<i32>} : memref<8x1xf32, #tpu.memory_space<vmem>>, vector<8x1xf32>,
    } else {
    }
    %c0 = arith.constant 0 : index
    %c0_4 = arith.constant 0 : index
    %8 = vector.load %arg2[%c0, %c0_4] : memref<8x32xf32, #tpu.memory_space<vmem>>, vector<8x32xf32>
    %cst = arith.constant 1.000000e+01 : f32
    %9 = vector.broadcast %cst : f32 to vector<8x32xf32>
    %10 = arith.mulf %8, %9 : vector<8x32xf32>
    %11 = tpu.iota {dimensions = array<i32: 1>} : vector<8x32xi32>
    %c32_i32 = arith.constant 32 : i32
    %12 = arith.muli %arg1, %c32_i32 : i32
    %13 = vector.broadcast %12 : i32 to vector<8x32xi32>
    %14 = arith.addi %11, %13 : vector<8x32xi32>
    %c32_i32_5 = arith.constant 32 : i32
    %15 = vector.broadcast %c32_i32_5 : i32 to vector<8x32xi32>
    %16 = arith.cmpi slt, %14, %15 : vector<8x32xi32>
    %cst_6 = arith.constant 0xFF800000 : f32
    %17 = vector.broadcast %cst_6 : f32 to vector<8x32xf32>
    %18 = arith.select %16, %10, %17 : vector<8x32xi1>, vector<8x32xf32>
    %c0_7 = arith.constant 0 : index
    %c0_8 = arith.constant 0 : index
    %19 = vector.load %arg5[%c0_7, %c0_8] : memref<8x1xf32, #tpu.memory_space<vmem>>, vector<8x1xf32>
    %cst_9 = arith.constant dense<0xFF800000> : vector<8xf32>
    %20 = vector.multi_reduction <maximumf>, %18, %cst_9 [1] : vector<8x32xf32> to vector<8xf32>
    %21 = vector.shape_cast %20 : vector<8xf32> to vector<8x1xf32>
    %22 = arith.maximumf %19, %21 : vector<8x1xf32>
    %23 = vector.broadcast %22 : vector<8x1xf32> to vector<8x32xf32>
    %24 = arith.subf %18, %23 : vector<8x32xf32>
    %25 = math.exp %24 : vector<8x32xf32>
    %c0_10 = arith.constant 0 : index
    %c0_11 = arith.constant 0 : index
    %26 = vector.load %arg6[%c0_10, %c0_11] : memref<8x1xf32, #tpu.memory_space<vmem>>, vector<8x1xf32>
    %27 = arith.subf %19, %22 : vector<8x1xf32>
    %28 = math.exp %27 : vector<8x1xf32>
    %29 = arith.mulf %26, %28 : vector<8x1xf32>
    %cst_12 = arith.constant dense<0.000000e+00> : vector<8xf32>
    %30 = vector.multi_reduction <add>, %25, %cst_12 [1] : vector<8x32xf32> to vector<8xf32>
    %31 = vector.shape_cast %30 : vector<8xf32> to vector<8x1xf32>
    %32 = arith.addf %29, %31 : vector<8x1xf32>
    %c0_13 = arith.constant 0 : index
    %c0_14 = arith.constant 0 : index
    %33 = vector.load %arg6[%c0_13, %c0_14] : memref<8x1xf32, #tpu.memory_space<vmem>>, vector<8x1xf32>
    tpu.vector_store %arg6[%c0_13, %c0_14], %32 {strides = array<i32>} : memref<8x1xf32, #tpu.memory_space<vmem>>, vector<8x1xf32>,
    %c0_15 = arith.constant 0 : index
    %c0_16 = arith.constant 0 : index
    %34 = vector.load %arg5[%c0_15, %c0_16] : memref<8x1xf32, #tpu.memory_space<vmem>>, vector<8x1xf32>
    tpu.vector_store %arg5[%c0_15, %c0_16], %22 {strides = array<i32>} : memref<8x1xf32, #tpu.memory_space<vmem>>, vector<8x1xf32>,
    %c0_17 = arith.constant 0 : index
    %c0_18 = arith.constant 0 : index
    %35 = vector.load %arg3[%c0_17, %c0_18] : memref<8x1xi32, #tpu.memory_space<vmem>>, vector<8x1xi32>
    %c0_19 = arith.constant 0 : index
    %c0_20 = arith.constant 0 : index
    %36 = vector.load %arg7[%c0_19, %c0_20] : memref<8x1xf32, #tpu.memory_space<vmem>>, vector<8x1xf32>
    %37 = vector.broadcast %35 : vector<8x1xi32> to vector<8x32xi32>
    %38 = arith.cmpi eq, %14, %37 : vector<8x32xi32>
    %cst_21 = arith.constant 0.000000e+00 : f32
    %39 = vector.broadcast %cst_21 : f32 to vector<8x32xf32>
    %40 = arith.select %38, %10, %39 : vector<8x32xi1>, vector<8x32xf32>
    %cst_22 = arith.constant dense<0.000000e+00> : vector<8xf32>
    %41 = vector.multi_reduction <add>, %40, %cst_22 [1] : vector<8x32xf32> to vector<8xf32>
    %42 = vector.shape_cast %41 : vector<8xf32> to vector<8x1xf32>
    %43 = arith.addf %36, %42 : vector<8x1xf32>
    %c0_23 = arith.constant 0 : index
    %c0_24 = arith.constant 0 : index
    %44 = vector.load %arg7[%c0_23, %c0_24] : memref<8x1xf32, #tpu.memory_space<vmem>>, vector<8x1xf32>
    tpu.vector_store %arg7[%c0_23, %c0_24], %43 {strides = array<i32>} : memref<8x1xf32, #tpu.memory_space<vmem>>, vector<8x1xf32>,
    %c0_i32_25 = arith.constant 0 : i32
    %45 = arith.cmpi eq, %arg1, %c0_i32_25 : i32
    %46 = arith.extui %45 : i1 to i32
    %c0_i32_26 = arith.constant 0 : i32
    %47 = arith.cmpi ne, %46, %c0_i32_26 : i32
    scf.if %47 {
      %c0_30 = arith.constant 0 : index
      %c0_31 = arith.constant 0 : index
      %53 = vector.load %arg5[%c0_30, %c0_31] : memref<8x1xf32, #tpu.memory_space<vmem>>, vector<8x1xf32>
      %c0_32 = arith.constant 0 : index
      %c0_33 = arith.constant 0 : index
      %54 = vector.load %arg6[%c0_32, %c0_33] : memref<8x1xf32, #tpu.memory_space<vmem>>, vector<8x1xf32>
      %55 = math.log %54 : vector<8x1xf32>
      %56 = arith.addf %53, %55 : vector<8x1xf32>
      %c0_34 = arith.constant 0 : index
      %c0_35 = arith.constant 0 : index
      %57 = vector.load %arg7[%c0_34, %c0_35] : memref<8x1xf32, #tpu.memory_space<vmem>>, vector<8x1xf32>
      %58 = arith.subf %56, %57 : vector<8x1xf32>
      %59 = tpu.iota {dimensions = array<i32: 0>} : vector<8x1xi32>
      %c8_i32 = arith.constant 8 : i32
      %60 = arith.muli %arg0, %c8_i32 : i32
      %61 = vector.broadcast %60 : i32 to vector<8x1xi32>
      %62 = arith.addi %59, %61 : vector<8x1xi32>
      %c8_i32_36 = arith.constant 8 : i32
      %63 = vector.broadcast %c8_i32_36 : i32 to vector<8x1xi32>
      %64 = arith.cmpi slt, %62, %63 : vector<8x1xi32>
      %cst_37 = arith.constant 0.000000e+00 : f32
      %65 = vector.broadcast %cst_37 : f32 to vector<8x1xf32>
      %66 = arith.select %64, %58, %65 : vector<8x1xi1>, vector<8x1xf32>
      %c0_38 = arith.constant 0 : index
      %c0_39 = arith.constant 0 : index
      %67 = vector.load %arg9[%c0_38, %c0_39] : memref<8x1xf32, #tpu.memory_space<vmem>>, vector<8x1xf32>
      %68 = arith.addf %67, %66 : vector<8x1xf32>
      %c0_40 = arith.constant 0 : index
      %c0_41 = arith.constant 0 : index
      %69 = vector.load %arg9[%c0_40, %c0_41] : memref<8x1xf32, #tpu.memory_space<vmem>>, vector<8x1xf32>
      tpu.vector_store %arg9[%c0_40, %c0_41], %68 {strides = array<i32>} : memref<8x1xf32, #tpu.memory_space<vmem>>, vector<8x1xf32>,
    } else {
    }
    %c0_i32_27 = arith.constant 0 : i32
    %48 = arith.cmpi eq, %arg0, %c0_i32_27 : i32
    %c0_i32_28 = arith.constant 0 : i32
    %49 = arith.cmpi eq, %arg1, %c0_i32_28 : i32
    %50 = arith.andi %48, %49 : i1
    %51 = arith.extui %50 : i1 to i32
    %c0_i32_29 = arith.constant 0 : i32
    %52 = arith.cmpi ne, %51, %c0_i32_29 : i32
    scf.if %52 {
      %cst_30 = arith.constant 0.000000e+00 : f32
      %53 = vector.broadcast %cst_30 : f32 to vector<8x128xf32>
      %c0_31 = arith.constant 0 : index
      %c0_32 = arith.constant 0 : index
      %54 = vector.load %arg9[%c0_31, %c0_32] : memref<8x1xf32, #tpu.memory_space<vmem>>, vector<8x1xf32>
      %55 = vector.shape_cast %54 : vector<8x1xf32> to vector<1x8x1xf32>
      %cst_33 = arith.constant dense<0.000000e+00> : vector<1xf32>
      %56 = vector.multi_reduction <add>, %55, %cst_33 [1, 2] : vector<1x8x1xf32> to vector<1xf32>
      %57 = vector.shape_cast %56 : vector<1xf32> to vector<1x1x1xf32>
      %58 = vector.extract %57[0, 0, 0] : f32 from vector<1x1x1xf32>
      %59 = vector.broadcast %58 : f32 to vector<8x128xf32>
      %60 = arith.addf %53, %59 : vector<8x128xf32>
      %c0_34 = arith.constant 0 : index
      %c0_35 = arith.constant 0 : index
      %61 = vector.load %arg4[%c0_34, %c0_35] : memref<8x128xf32, #tpu.memory_space<vmem>>, vector<8x128xf32>
      tpu.vector_store %arg4[%c0_34, %c0_35], %60 {strides = array<i32>} : memref<8x128xf32, #tpu.memory_space<vmem>>, vector<8x128xf32>,
    } else {
    }
    return
  }
  func.func @transform_0(%arg0: i32, %arg1: i32) -> (i32, i32) {
    %c0_i32 = arith.constant 0 : i32
    return %arg0, %arg1 : i32, i32
  }
  func.func @transform_1(%arg0: i32, %arg1: i32) -> (i32, i32) {
    %c0_i32 = arith.constant 0 : i32
    %c0_i32_0 = arith.constant 0 : i32
    return %arg0, %c0_i32 : i32, i32
  }
  func.func @transform_2(%arg0: i32, %arg1: i32) -> (i32, i32) {
    %c0_i32 = arith.constant 0 : i32
    %c0_i32_0 = arith.constant 0 : i32
    %c0_i32_1 = arith.constant 0 : i32
    return %c0_i32, %c0_i32_0 : i32, i32
  }
}

</mosaic_0001>

<bundles_post_ra>
// kernel: tpu_custom_call.1
= control target key start
LH: loop header
LB: loop body
LE: loop exit
PB: predicated region body
PF: predicated region fallthrough
CT: control target
= control target key end

     0   :  { %v29_v1 = vlaneseq  ;;  %s211_s0 = inlined_call_operand.vmem [shape: f32[8,32], index: 0, kind: input, shape index: {}]   ;;  %s212_s1 = inlined_call_operand.vmem [shape: s32[8,1], index: 1, kind: input, shape index: {}]   ;;  %s213_s2 = inlined_call_operand.hbm [shape: f32[8,128], index: 2, kind: output, shape index: {}]  }
   0x1   :  { %v27_v0 = vld [vmem:[%s211_s0] sm:$0xff] }
   0x2   :  { %7 = vsyncpa [#allocation8], 0  ;;  %v28_v2 = vmul.f32 10.0, %v27_v0  ;;  %v30_v3 = vand.u32 127, %v29_v1  ;;  %vm37_vm0 = vcmask 261120   ;;  %vm18_vm2 = vcmask 7168  }
   0x3   :  { %v162_v6 = vmov -inf   ;;  %v163_v7 = vmov 0   ;;  %v62_v8 = vld [vmem:[%s212_s1] sm:$0xff]  ;;  %v164_v9 = vmov 0.0   ;;  %s165_s0 = smov [#allocation7]  }
   0x4   :  { %vm34_vm1 = vcmp.lt.s32.totalorder %v30_v3, 32  ;;  %24 = vst.msk [vmem:[#allocation2] sm:$0xff] %vm18_vm2, %v162_v6  ;;  %130 = vset.pattern.permute.xlu0 %v163_v7  ;;  %131 = vset.pattern.permute.xlu1 %v163_v7  ;;  %25 = vst.msk [vmem:[#allocation3] sm:$0xff] %vm18_vm2, %v164_v9  ;;  %s116_s1 = sshll.u32 %s165_s0, 4  ;;  %s117_s1 = int_to_ptr.vmem [resolvable:$true] %s116_s1 }
   0x5   :  { %v35_v4 = vsel %vm34_vm1, %v28_v2, -inf  ;;  %19 = vst.msk [vmem:[#allocation6] sm:$0xff] %vm18_vm2, %v164_v9  ;;  %26 = vst.msk [vmem:[#allocation4] sm:$0xff] %vm18_vm2, %v164_v9  ;;  %65 = vperm.xlu1 %131, %v62_v8   ;;  %s138_s14 = scalar_lea.vmem %s117_s1, 128  ;;  %p143_p1 = scmp.lt.s32.totalorder %s117_s1, %s117_s1 }
   0x6   :  { %v38_v5 = vsel %vm37_vm0, %v35_v4, -inf  ;;  %p139_p0 = scmp.ne.s32.totalorder %s117_s1, %s138_s14  ;;  %p144_p2 = scmp.lt.s32.totalorder %s138_s14, %s138_s14 }
   0x7   :  { %39 = vmax.xlane.f32.xlu0 %v38_v5 }
   0x8   :  { %p145_p3 = por %p144_p2, %p143_p1 }
   0xa   :  { %p146_p4 = pnand %p145_p3, %p139_p0 }
   0xb   :  { %v36_v10 = vld [vmem:[#allocation2] sm:$0xff]  ;;  %v50_v24 = vld [vmem:[#allocation3] sm:$0xff] }
   0xc   :  { %v63_v28 = vld [vmem:[#allocation4] sm:$0xff]  ;;  %v91_v37 = vld [vmem:[#allocation6] sm:$0xff] }
  0x84   :  { %v66_v17 = vpop.permute.xlu1 %65 }
  0x85   :  { %vm67_vm3 = vcmp.eq.s32.totalorder %v30_v3, %v66_v17 }
  0x86   :  { %v68_v19 = vsel %vm67_vm3, %v28_v2, 0.0 }
  0x87   :  { %v69_v21 = vsel %vm37_vm0, %v68_v19, 0.0 }
  0x94   :  { %v40_v11 = vpop.xlane.xlu0 %39 }
  0x95   :  { %v41_v12 = vmax.f32 %v36_v10, %v40_v11 }
  0x97   :  { %v51_v13 = vsub.f32 %v36_v10, %v41_v12  ;;  %61 = vst.msk [vmem:[#allocation2] sm:$0xff] %vm18_vm2, %v41_v12  ;;  %44 = vperm.xlu0 %130, %v41_v12  }
  0x99   :  { %v52_v22 = vmul.f32 1.442695, %v51_v13 }
  0x9e   :  { %v77_v34 = vld [vmem:[#allocation2] sm:$0xff] }
 0x116   :  { %v45_v14 = vpop.permute.xlu0 %44 }
 0x117   :  { %v47_v15 = vsub.f32 %v35_v4, %v45_v14 }
 0x119   :  { %v48_v16 = vmul.f32 1.442695, %v47_v15 }
 0x11b   :  { %132 = vpow2.f32 %v48_v16 }
 0x11c   :  { %134 = vpow2.f32 %v52_v22 }
 0x125   :  { %v133_v18 = vpop.eup %132 }
 0x126   :  { %v55_v20 = vsel %vm37_vm0, %v133_v18, 0.0  ;;  %v135_v23 = vpop.eup %134 }
 0x127   :  { %56 = vadd.xlane.f32.xlu1 %v55_v20  ;;  %v54_v25 = vmul.f32 %v135_v23, %v50_v24 }
 0x12b   :  { %70 = vadd.xlane.f32.xlu1 %v69_v21 }
 0x1b4   :  { %v57_v26 = vpop.xlane.xlu1 %56 }
 0x1b5   :  { %v58_v27 = vadd.f32 %v57_v26, %v54_v25 }
 0x1b7   :  { %60 = vst.msk [vmem:[#allocation3] sm:$0xff] %vm18_vm2, %v58_v27 }
 0x1b8   :  { %v71_v29 = vpop.xlane.xlu1 %70 }
 0x1b9   :  { %v72_v30 = vadd.f32 %v71_v29, %v63_v28 }
 0x1bb   :  { %73 = vst.msk [vmem:[#allocation4] sm:$0xff] %vm18_vm2, %v72_v30 }
 0x1be   :  { %v78_v31 = vld [vmem:[#allocation3] sm:$0xff] }
 0x1bf   :  { %136 = vlog2.f32 %v78_v31 }
 0x1c2   :  { %v82_v35 = vld [vmem:[#allocation4] sm:$0xff] }
 0x1c9   :  { %v137_v32 = vpop.eup %136 }
 0x1ca   :  { %v80_v33 = vmul.f32 0.6931472, %v137_v32 }
 0x1cc   :  { %v81_v36 = vadd.f32 %v80_v33, %v77_v34 }
 0x1ce   :  { %v83_v38 = vsub.f32 %v81_v36, %v82_v35 }
 0x1d0   :  { %v92_v39 = vadd.f32 %v91_v37, %v83_v38 }
 0x1d2   :  { %93 = vst.msk [vmem:[#allocation6] sm:$0xff] %vm18_vm2, %v92_v39 }
 0x1d9   :  { %v96_v40 = vld [vmem:[#allocation6] sm:$0xff] }
 0x1da   :  { %v97_v41 = vsel %vm18_vm2, %v96_v40, 0.0 }
 0x1db   :  { %98 = vadd.xlane.f32.xlu1 %v97_v41 }
 0x268   :  { %v99_v42 = vpop.xlane.xlu1 %98 }
 0x269   :  { %v100_v43 = vrot.slane %v99_v42, 4 }
 0x26b   :  { %v101_v44 = vadd.f32 %v100_v43, %v99_v42 }
 0x26d   :  { %v102_v45 = vrot.slane %v101_v44, 2 }
 0x26f   :  { %v103_v46 = vadd.f32 %v102_v45, %v101_v44 }
 0x271   :  { %v104_v47 = vrot.slane %v103_v46, 1 }
 0x273   :  { %v105_v48 = vadd.f32 %v104_v47, %v103_v46 }
 0x275   :  { %124 = vpush %v105_v48 }
 0x2a6   :  { %s125_s13 = spop %124 }
 0x2a7   :  { %v107_v49 = vstv %s125_s13 }
 0x2a8   :  { %109 = vst [vmem:[#allocation7] sm:$0xff] %v107_v49 }
 0x2a9   :  { %149 = shalt.err (!%p146_p4)
}
 0x2aa   :  { %s150_s17 = scalar_lea.hbm %s213_s2, 128 }
 0x2ab   :  { %p151_p5 = scmp.ne.s32.totalorder %s213_s2, %s150_s17  ;;  %p154_p6 = scmp.lt.u32.totalorder %s150_s17, %s213_s2 }
 0x2ad   :  { %p156_p7 = pnand %p154_p6, %p151_p5 }
 0x2af   :  { %159 = shalt.err (!%p156_p7)
}
 0x2b0   :  { %119 = dma.vmem_to_hbm [thread:$0]  %s117_s1, 128, %s213_s2, [#allocation8]  }
 0x2b1   :  { %160 = dma.done.wait [#allocation8], 128  }
 0x2b2   :  { %161 = vsyncadd [#allocation8], 4294967168 }
 0x2b3   :  { %123 = vsyncpa [#allocation8], 1 }

</bundles_post_ra>
